<compile_context>
chip_gen: v7x
topology: tpu7x:2x2x1
jax: 0.10.0
libtpu: 0.0.40
codegen_flags: <defaults>
</compile_context>

<pallas_src>
import functools

import jax
import jax.numpy as jnp
from jax import lax
from jax.experimental import pallas as pl
from jax.experimental.pallas import tpu as pltpu

LANE = 128
_VMEM_LIMIT_BYTES = 32 * 1024 * 1024  # explicit, safe headroom on v5e/v6e/v7x


def _round_up(n, m):
    return ((n + m - 1) // m) * m


# ============================================================================
# Pallas kernel 1: fused row matmul   y = [relu]( x @ w + b [+ residual] )
#   x:(M,K) bf16, w:(K,Cout) bf16 (BN scale pre-folded), b:(1,Cout) f32.
#   Used for the 1x1 convs (merged conv1_1/conv1_2, conv3+residual+final ReLU)
#   and the tiny pooled-branch convs (fed by a small im2col).
# ============================================================================
def _rowmm_kernel(*refs, relu, has_res):
    if has_res:
        x_ref, w_ref, b_ref, r_ref, o_ref = refs
    else:
        x_ref, w_ref, b_ref, o_ref = refs
        r_ref = None
    acc = jnp.dot(x_ref[...], w_ref[...], preferred_element_type=jnp.float32)
    y = acc + b_ref[...]
    if r_ref is not None:
        y = y + r_ref[...].astype(jnp.float32)
    if relu:
        y = jnp.maximum(y, 0.0)
    o_ref[...] = y.astype(o_ref.dtype)


def _choose_tm(m):
    # Large tiles (low per-step overhead) but >=2 grid steps when possible so
    # v7x can shard the "parallel" grid across both TensorCores.
    if m >= 1024:
        return 512
    if m >= 512:
        return 256
    if m >= 256:
        return 128
    return _round_up(m, 8)


def pallas_rowmm(x, w, b, residual=None, relu=False, out_dtype=jnp.float32):
    m, k = x.shape
    cout = w.shape[1]
    tm = _choose_tm(m)
    grid = (pl.cdiv(m, tm),)

    in_specs = [
        pl.BlockSpec((tm, k), lambda i: (i, 0)),
        pl.BlockSpec((k, cout), lambda i: (0, 0)),
        pl.BlockSpec((1, cout), lambda i: (0, 0)),
    ]
    args = [x, w, b]
    if residual is not None:
        in_specs.append(pl.BlockSpec((tm, cout), lambda i: (i, 0)))
        args.append(residual)

    kernel = functools.partial(_rowmm_kernel, relu=relu,
                               has_res=residual is not None)
    return pl.pallas_call(
        kernel,
        out_shape=jax.ShapeDtypeStruct((m, cout), out_dtype),
        grid=grid,
        in_specs=in_specs,
        out_specs=pl.BlockSpec((tm, cout), lambda i: (i, 0)),
        compiler_params=pltpu.CompilerParams(
            dimension_semantics=("parallel",),
            vmem_limit_bytes=_VMEM_LIMIT_BYTES),
    )(*args)


# ============================================================================
# Pallas kernel 2: kh x kw conv with the taps built in-kernel (no im2col HBM
# blowup).  Grid over batch; each step loads one spatially padded NHWC slab
# and accumulates kh*kw MXU matmuls in f32.  Optional fusions:
#   - n_pre > 1 : pre-conv inputs are summed (+ReLU) in VMEM first
#                 (used for conv2_6(relu(x2_4 + x2_5))),
#   - residuals : added to the conv result before the output ReLU
#                 (used for relu(conv2_0(x1) + x2_2 + x2_3)).
# ============================================================================
def _conv_tap_kernel(*refs, kh, kw, h, w, n_pre, n_res, pre_relu, relu):
    pre_refs = refs[:n_pre]
    w_ref = refs[n_pre]                          # (kh*kw, Cin_p, Cout_p) bf16
    b_ref = refs[n_pre + 1]                      # (1, Cout_p) f32
    res_refs = refs[n_pre + 2:n_pre + 2 + n_res]
    o_ref = refs[n_pre + 2 + n_res]
    xsum_ref = refs[n_pre + 3 + n_res] if n_pre > 1 else None

    if n_pre > 1:
        # Sum (+ ReLU) the pre-conv inputs once, in f32, store bf16 in VMEM.
        xs = pre_refs[0][0].astype(jnp.float32)
        for r in pre_refs[1:]:
            xs = xs + r[0].astype(jnp.float32)
        if pre_relu:
            xs = jnp.maximum(xs, 0.0)
        xsum_ref[...] = xs.astype(xsum_ref.dtype)

        def tap(di, dj):
            return xsum_ref[di:di + h, dj:dj + w, :]
    else:
        def tap(di, dj):
            return pre_refs[0][0, di:di + h, dj:dj + w, :]

    cout = o_ref.shape[-1]
    acc = None
    t = 0
    for di in range(kh):
        for dj in range(kw):
            lhs = tap(di, dj).reshape(h * w, -1)          # (H*W, Cin_p) bf16
            part = jnp.dot(lhs, w_ref[t],
                           preferred_element_type=jnp.float32)
            acc = part if acc is None else acc + part
            t += 1

    y = acc + b_ref[...]                                  # f32 epilogue
    for r in res_refs:
        y = y + r[0].reshape(h * w, cout).astype(jnp.float32)
    if relu:
        y = jnp.maximum(y, 0.0)
    o_ref[0] = y.reshape(h, w, cout).astype(o_ref.dtype)


def pallas_conv_taps(x_pads, w_taps, b, kh, kw, residuals=(), pre_relu=False,
                     relu=False, out_dtype=jnp.float32):
    """x_pads: list of (N, H+kh-1, W+kw-1, Cin_p) bf16 (summed [+relu] pre-conv).
       w_taps: (kh*kw, Cin_p, Cout_p) bf16 (BN scale folded).  b: (1, Cout_p) f32.
       residuals: list of (N, H, W, Cout_p) added after the conv."""
    n_pre, n_res = len(x_pads), len(residuals)
    n, hp, wp, cp = x_pads[0].shape
    h, w = hp - (kh - 1), wp - (kw - 1)
    cout = w_taps.shape[-1]
    # In-kernel (H, W, C) -> (H*W, C) collapse is a free relayout only when the
    # width is sublane-aligned; the odd-width pooled branches use conv_small().
    assert w % 8 == 0, "tap-conv kernel requires sublane-aligned output width"

    in_specs = (
        [pl.BlockSpec((1, hp, wp, cp), lambda i: (i, 0, 0, 0))] * n_pre
        + [pl.BlockSpec((kh * kw, cp, cout), lambda i: (0, 0, 0)),
           pl.BlockSpec((1, cout), lambda i: (0, 0))]
        + [pl.BlockSpec((1, h, w, cout), lambda i: (i, 0, 0, 0))] * n_res)
    scratch = [pltpu.VMEM((hp, wp, cp), x_pads[0].dtype)] if n_pre > 1 else []

    kernel = functools.partial(_conv_tap_kernel, kh=kh, kw=kw, h=h, w=w,
                               n_pre=n_pre, n_res=n_res,
                               pre_relu=pre_relu, relu=relu)
    return pl.pallas_call(
        kernel,
        out_shape=jax.ShapeDtypeStruct((n, h, w, cout), out_dtype),
        grid=(n,),
        in_specs=in_specs,
        out_specs=pl.BlockSpec((1, h, w, cout), lambda i: (i, 0, 0, 0)),
        scratch_shapes=scratch,
        compiler_params=pltpu.CompilerParams(
            dimension_semantics=("parallel",),
            vmem_limit_bytes=_VMEM_LIMIT_BYTES),
    )(*x_pads, w_taps, b, *residuals)


# ============================================================================
# Plain-JAX glue: spatial pad, small im2col, adaptive avg pool, nearest resize.
# ============================================================================
def spat_pad(x, ph, pw):
    return jnp.pad(x, ((0, 0), (ph, ph), (pw, pw), (0, 0)))


def im2col(x, kh, kw, ph, pw):
    n, h, w, c = x.shape
    xp = spat_pad(x, ph, pw)
    cols = [xp[:, i:i + h, j:j + w, :] for i in range(kh) for j in range(kw)]
    return jnp.concatenate(cols, axis=-1).reshape(n * h * w, kh * kw * c)


def adaptive_pool_matrix(n_in, n_out):
    i = jnp.arange(n_out)
    starts = (i * n_in) // n_out
    ends = ((i + 1) * n_in + n_out - 1) // n_out  # ceil
    idx = jnp.arange(n_in)
    mask = (idx[None, :] >= starts[:, None]) & (idx[None, :] < ends[:, None])
    return mask.astype(jnp.float32) / (ends - starts)[:, None].astype(jnp.float32)


def adaptive_avg_pool(x_nhwc, oh, ow):
    _, h, w, _ = x_nhwc.shape
    ph = adaptive_pool_matrix(h, oh)
    pw = adaptive_pool_matrix(w, ow)
    return jnp.einsum('ph,nhwc,qw->npqc', ph, x_nhwc.astype(jnp.float32), pw)


def nearest_resize(x_nhwc, oh, ow):
    # PyTorch F.interpolate(mode='nearest'): src = floor(dst * in/out)
    _, h, w, _ = x_nhwc.shape
    hi = (jnp.arange(oh) * h) // oh
    wi = (jnp.arange(ow) * w) // ow
    return x_nhwc[:, hi][:, :, wi]


def conv_small(x_nhwc, p, relu=False):
    # Tiny pooled / strip tensors: launch-overhead bound, so a small im2col +
    # fused row matmul is fine (HBM blowup is negligible at these sizes).
    n, h, w, _ = x_nhwc.shape
    kh, kw, ph, pw = p['k']
    patches = im2col(x_nhwc.astype(jnp.bfloat16), kh, kw, ph, pw)
    y = pallas_rowmm(patches, p['w_mat'], p['bias'], relu=relu)
    return y.reshape(n, h, w, -1)


# ============================================================================
# StripPooling forward (Pallas path).
# ============================================================================
def strip_pooling_pallas(x_nchw, params, pool_size=(20, 12)):
    kp = params['kernel']
    cp_full, icp = kp['Cp'], kp['icp']
    c = x_nchw.shape[1]

    x = jnp.transpose(x_nchw, (0, 2, 3, 1))                      # NHWC f32
    n, h, w, _ = x.shape
    x_p = jnp.pad(x, ((0, 0), (0, 0), (0, 0), (0, cp_full - c)))  # lane-padded
    x_pb = x_p.astype(jnp.bfloat16)
    m = n * h * w

    # conv1_1 + conv1_2 merged into a single lane-dense matmul (+ReLU).
    y12 = pallas_rowmm(x_pb.reshape(m, cp_full), kp['w1'], kp['b1'],
                       relu=True, out_dtype=jnp.bfloat16)
    y12 = y12.reshape(n, h, w, 2 * icp)
    x1, x2 = y12[..., :icp], y12[..., icp:]                      # bf16

    # ---- x1 branch: square pooled contexts + 3x3 convs ---------------------
    x2_2 = nearest_resize(
        conv_small(adaptive_avg_pool(x1, pool_size[0], pool_size[0]),
                   kp['conv2_1']), h, w)                         # f32
    x2_3 = nearest_resize(
        conv_small(adaptive_avg_pool(x1, pool_size[1], pool_size[1]),
                   kp['conv2_2']), h, w)                         # f32

    # relu(conv2_0(x1) + x2_2 + x2_3): residual adds + ReLU fused in-kernel.
    s1 = pallas_conv_taps([spat_pad(x1, 1, 1)],
                          kp['conv2_0']['taps'], kp['conv2_0']['bias'],
                          kh=3, kw=3, residuals=[x2_2, x2_3], relu=True,
                          out_dtype=jnp.bfloat16)
    # conv2_5 (+BN+ReLU).
    x1b = pallas_conv_taps([spat_pad(s1, 1, 1)],
                           kp['conv2_5']['taps'], kp['conv2_5']['bias'],
                           kh=3, kw=3, relu=True, out_dtype=jnp.bfloat16)

    # ---- x2 branch: strip pooling -------------------------------------------
    x2_4 = nearest_resize(conv_small(adaptive_avg_pool(x2, 1, w),
                                     kp['conv2_3']), h, w)       # f32
    x2_5 = nearest_resize(conv_small(adaptive_avg_pool(x2, h, 1),
                                     kp['conv2_4']), h, w)       # f32

    # conv2_6(relu(x2_4 + x2_5)): the sum + ReLU happens in VMEM in-kernel.
    x2b = pallas_conv_taps(
        [spat_pad(x2_4.astype(jnp.bfloat16), 1, 1),
         spat_pad(x2_5.astype(jnp.bfloat16), 1, 1)],
        kp['conv2_6']['taps'], kp['conv2_6']['bias'],
        kh=3, kw=3, pre_relu=True, relu=True, out_dtype=jnp.bfloat16)

    # ---- conv3 + residual x + final ReLU (fused, f32 epilogue) --------------
    cat = jnp.concatenate([x1b, x2b], axis=-1).reshape(m, 2 * icp)
    out = pallas_rowmm(cat, kp['w3'], kp['b3'],
                       residual=x_p.reshape(m, cp_full), relu=True,
                       out_dtype=jnp.float32)
    out = out.reshape(n, h, w, cp_full)[..., :c]
    return jnp.transpose(out, (0, 3, 1, 2))                      # back to NCHW


# ============================================================================
# Reference path (lax.conv, matched bf16 matmul operand precision, f32 rest).
# ============================================================================
def ref_conv_bn(x_nhwc, p, relu=False, residual=None):
    kh, kw, ph, pw = p['k']
    w_hwio = jnp.transpose(p['w'], (2, 3, 1, 0)).astype(jnp.bfloat16)
    y = lax.conv_general_dilated(
        x_nhwc.astype(jnp.bfloat16), w_hwio, window_strides=(1, 1),
        padding=((ph, ph), (pw, pw)),
        dimension_numbers=('NHWC', 'HWIO', 'NHWC'),
        preferred_element_type=jnp.float32)
    y = y * p['scale'].reshape(1, 1, 1, -1) + p['bias'].reshape(1, 1, 1, -1)
    if residual is not None:
        y = y + residual
    if relu:
        y = jnp.maximum(y, 0.0)
    return y


def strip_pooling_reference(x_nchw, params, pool_size=(20, 12)):
    raw = params['raw']
    x = jnp.transpose(x_nchw, (0, 2, 3, 1))
    _, h, w, _ = x.shape
    x1 = ref_conv_bn(x, raw['conv1_1'], relu=True)
    x2 = ref_conv_bn(x, raw['conv1_2'], relu=True)
    x2_1 = ref_conv_bn(x1, raw['conv2_0'])
    x2_2 = nearest_resize(ref_conv_bn(
        adaptive_avg_pool(x1, pool_size[0], pool_size[0]), raw['conv2_1']), h, w)
    x2_3 = nearest_resize(ref_conv_bn(
        adaptive_avg_pool(x1, pool_size[1], pool_size[1]), raw['conv2_2']), h, w)
    x2_4 = nearest_resize(ref_conv_bn(
        adaptive_avg_pool(x2, 1, w), raw['conv2_3']), h, w)
    x2_5 = nearest_resize(ref_conv_bn(
        adaptive_avg_pool(x2, h, 1), raw['conv2_4']), h, w)
    x1b = ref_conv_bn(jnp.maximum(x2_1 + x2_2 + x2_3, 0.0), raw['conv2_5'],
                      relu=True)
    x2b = ref_conv_bn(jnp.maximum(x2_5 + x2_4, 0.0), raw['conv2_6'], relu=True)
    out = ref_conv_bn(jnp.concatenate([x1b, x2b], axis=-1), raw['conv3'],
                      relu=True, residual=x)
    return jnp.transpose(out, (0, 3, 1, 2))


# ============================================================================
# Deterministic parameter init (eval-mode BN folded; lane-padded bf16 weights).
# ============================================================================
def init_params(key, in_channels):
    c = in_channels
    ic = c // 4
    cp = _round_up(c, LANE)
    icp = _round_up(ic, LANE)
    keys = jax.random.split(key, 10)

    def conv_bn(k, cin, cout, kh, kw, ph, pw):
        k1, k2, k3, k4, k5 = jax.random.split(k, 5)
        wgt = jax.random.normal(k1, (cout, cin, kh, kw), jnp.float32) * 0.1
        gamma = 1.0 + 0.1 * jax.random.normal(k2, (cout,), jnp.float32)
        beta = 0.1 * jax.random.normal(k3, (cout,), jnp.float32)
        mean = 0.1 * jax.random.normal(k4, (cout,), jnp.float32)
        var = 0.9 + 0.1 * jnp.abs(jax.random.normal(k5, (cout,), jnp.float32))
        scale = gamma / jnp.sqrt(var + 1e-5)
        bias = beta - mean * scale
        return dict(w=wgt, scale=scale, bias=bias, k=(kh, kw, ph, pw))

    raw = {
        'conv1_1': conv_bn(keys[0], c, ic, 1, 1, 0, 0),
        'conv1_2': conv_bn(keys[1], c, ic, 1, 1, 0, 0),
        'conv2_0': conv_bn(keys[2], ic, ic, 3, 3, 1, 1),
        'conv2_1': conv_bn(keys[3], ic, ic, 3, 3, 1, 1),
        'conv2_2': conv_bn(keys[4], ic, ic, 3, 3, 1, 1),
        'conv2_3': conv_bn(keys[5], ic, ic, 1, 3, 0, 1),
        'conv2_4': conv_bn(keys[6], ic, ic, 3, 1, 1, 0),
        'conv2_5': conv_bn(keys[7], ic, ic, 3, 3, 1, 1),
        'conv2_6': conv_bn(keys[8], ic, ic, 3, 3, 1, 1),
        'conv3':   conv_bn(keys[9], 2 * ic, c, 1, 1, 0, 0),
    }

    def folded_taps(p, cin_pad, cout_pad):
        # (kh*kw, cin_pad, cout_pad) bf16 with BN scale folded into the weights;
        # pad rows/cols are zero so pad channels stay exactly zero end-to-end.
        wgt, scale = p['w'], p['scale']
        cout, cin, kh, kw = wgt.shape
        wf = wgt * scale[:, None, None, None]
        taps = jnp.transpose(wf, (2, 3, 1, 0)).reshape(kh * kw, cin, cout)
        taps = jnp.pad(taps, ((0, 0), (0, cin_pad - cin), (0, cout_pad - cout)))
        bias = jnp.pad(p['bias'], (0, cout_pad - cout)).reshape(1, cout_pad)
        return taps.astype(jnp.bfloat16), bias.astype(jnp.float32)

    kparams = {'Cp': cp, 'icp': icp}
    for name in ('conv2_0', 'conv2_1', 'conv2_2', 'conv2_3', 'conv2_4',
                 'conv2_5', 'conv2_6'):
        taps, bias = folded_taps(raw[name], icp, icp)
        kh, kw, _, _ = raw[name]['k']
        kparams[name] = dict(taps=taps,
                             w_mat=taps.reshape(kh * kw * icp, icp),
                             bias=bias, k=raw[name]['k'])

    # conv1_1 + conv1_2 merged along Cout (they share the same input).
    t11, b11 = folded_taps(raw['conv1_1'], cp, icp)
    t12, b12 = folded_taps(raw['conv1_2'], cp, icp)
    kparams['w1'] = jnp.concatenate([t11[0], t12[0]], axis=1)     # (cp, 2*icp)
    kparams['b1'] = jnp.concatenate([b11, b12], axis=1)           # (1, 2*icp)

    # conv3: input channels live at [0:ic) (x1 half) and [icp:icp+ic) (x2 half).
    w3 = (raw['conv3']['w'][:, :, 0, 0] * raw['conv3']['scale'][:, None]).T
    w3p = jnp.zeros((2 * icp, cp), jnp.float32)
    w3p = w3p.at[:ic, :c].set(w3[:ic]).at[icp:icp + ic, :c].set(w3[ic:])
    kparams['w3'] = w3p.astype(jnp.bfloat16)
    kparams['b3'] = jnp.pad(raw['conv3']['bias'], (0, cp - c)).reshape(1, cp)

    return {'raw': raw, 'kernel': kparams}


if __name__ == "__main__":
    key = jax.random.PRNGKey(0)
    n, c, h, w = 2, 16, 16, 16          # in_channels must be divisible by 4
    k_x, k_p = jax.random.split(key)
    x_nchw = jax.random.normal(k_x, (n, c, h, w), jnp.float32)
    params = init_params(k_p, c)

    out = jax.block_until_ready(strip_pooling_pallas(x_nchw, params))
    assert out.shape == (n, c, h, w) and out.dtype == jnp.float32

    ref = jax.block_until_ready(strip_pooling_reference(x_nchw, params))
    max_err = float(jnp.max(jnp.abs(out - ref)))
    # bf16 MXU operands (f32 accumulation) vs a bf16-operand lax.conv reference:
    # remaining differences are intermediate-rounding / accumulation order only.
    assert max_err < 5e-2, f"mismatch vs reference: {max_err}"
    print("KERNEL_OK")
</pallas_src>

<mosaic_0001>
module attributes {stable_mosaic.version = 11 : i64} {
  func.func @_rowmm_kernel(%arg0: i32, %arg1: memref<256x128xbf16, #tpu.memory_space<vmem>>, %arg2: memref<128x256xbf16, #tpu.memory_space<vmem>>, %arg3: memref<1x256xf32, #tpu.memory_space<vmem>>, %arg4: memref<256x256xbf16, #tpu.memory_space<vmem>>) attributes {dimension_semantics = [#tpu.dimension_semantics<parallel>], iteration_bounds = array<i64: 2>, scalar_prefetch = 0 : i64, scratch_operands = 0 : i64, tpu.core_type = #tpu.core_type<tc>, window_params = [{transform_indices = @transform_0, window_bounds = array<i64: 256, 128>}, {pipeline_mode = #tpu.pipeline_mode<synchronous>, transform_indices = @transform_1, window_bounds = array<i64: 128, 256>}, {pipeline_mode = #tpu.pipeline_mode<synchronous>, transform_indices = @transform_2, window_bounds = array<i64: 1, 256>}, {transform_indices = @transform_3, window_bounds = array<i64: 256, 256>}]} {
    %c0 = arith.constant 0 : index
    %c0_0 = arith.constant 0 : index
    %0 = vector.load %arg1[%c0, %c0_0] : memref<256x128xbf16, #tpu.memory_space<vmem>>, vector<256x128xbf16>
    %c0_1 = arith.constant 0 : index
    %c0_2 = arith.constant 0 : index
    %1 = vector.load %arg2[%c0_1, %c0_2] : memref<128x256xbf16, #tpu.memory_space<vmem>>, vector<128x256xbf16>
    %cst = arith.constant dense<0.000000e+00> : vector<256x256xf32>
    %2 = tpu.matmul %0, %1, %cst {dimension_numbers = #tpu.dot_dimension_numbers<[1], [0], [0], [1], [0, 0, 1, 1], [], []>} : vector<256x128xbf16>, vector<128x256xbf16>, vector<256x256xf32> -> vector<256x256xf32>
    %c0_3 = arith.constant 0 : index
    %c0_4 = arith.constant 0 : index
    %3 = vector.load %arg3[%c0_3, %c0_4] : memref<1x256xf32, #tpu.memory_space<vmem>>, vector<1x256xf32>
    %4 = vector.broadcast %3 : vector<1x256xf32> to vector<256x256xf32>
    %5 = arith.addf %2, %4 : vector<256x256xf32>
    %cst_5 = arith.constant 0.000000e+00 : f32
    %6 = vector.broadcast %cst_5 : f32 to vector<256x256xf32>
    %7 = arith.maximumf %5, %6 : vector<256x256xf32>
    %8 = arith.truncf %7 : vector<256x256xf32> to vector<256x256xbf16>
    %c0_6 = arith.constant 0 : index
    %c0_7 = arith.constant 0 : index
    %9 = vector.load %arg4[%c0_6, %c0_7] : memref<256x256xbf16, #tpu.memory_space<vmem>>, vector<256x256xbf16>
    tpu.vector_store %arg4[%c0_6, %c0_7], %8 {strides = array<i32>} : memref<256x256xbf16, #tpu.memory_space<vmem>>, vector<256x256xbf16>,
    return
  }
  func.func @transform_0(%arg0: i32) -> (i32, i32) {
    %c0_i32 = arith.constant 0 : i32
    %c0_i32_0 = arith.constant 0 : i32
    return %arg0, %c0_i32 : i32, i32
  }
  func.func @transform_1(%arg0: i32) -> (i32, i32) {
    %c0_i32 = arith.constant 0 : i32
    %c0_i32_0 = arith.constant 0 : i32
    %c0_i32_1 = arith.constant 0 : i32
    return %c0_i32, %c0_i32_0 : i32, i32
  }
  func.func @transform_2(%arg0: i32) -> (i32, i32) {
    %c0_i32 = arith.constant 0 : i32
    %c0_i32_0 = arith.constant 0 : i32
    %c0_i32_1 = arith.constant 0 : i32
    return %c0_i32, %c0_i32_0 : i32, i32
  }
  func.func @transform_3(%arg0: i32) -> (i32, i32) {
    %c0_i32 = arith.constant 0 : i32
    %c0_i32_0 = arith.constant 0 : i32
    return %arg0, %c0_i32 : i32, i32
  }
}

</mosaic_0001>

<bundles_post_ra>
// kernel: tpu_custom_call.1
= control target key start
LH: loop header
LB: loop body
LE: loop exit
PB: predicated region body
PF: predicated region fallthrough
CT: control target
= control target key end

     0   :  { %8 = vsyncpa [#allocation3], 0  ;;  %s1760_s0 = inlined_call_operand.hbm [shape: bf16[512,128], index: 0, kind: input, shape index: {}]   ;;  %s1761_s1 = inlined_call_operand.hbm [shape: bf16[128,256], index: 1, kind: input, shape index: {}]   ;;  %s1762_s2 = inlined_call_operand.vmem [shape: f32[1,256], index: 2, kind: input, shape index: {}]   ;;  %s1763_s3 = inlined_call_operand.hbm [shape: bf16[512,256], index: 3, kind: output, shape index: {}]  }
   0x1   :  { %10 = vsyncpa [#allocation3 + $0x1], 0 }
   0x2   :  { %11 = vsyncpa [#allocation6], 0 }
   0x3   :  { %12 = vsyncpa [#allocation4], 0 }
   0x4   :  { %14 = vsyncpa [#allocation4 + $0x1], 0  ;;  %s1418_s12 = smov 0   ;;  %s1420_s13 = smov 0  }
   0x5   :  { %s1422_s14 = smov 0   ;;  %s1424_s15 = smov 0  }
   0x6 LB: > { %s1439_s16 = sadd.s32 4294967295, %s1386_s15   ;;  %s1022_s17 = sadd.s32 4294967294, %s1386_s15   ;;  %s1386_s15 = sphi %s1424_s15, %s1783_s15   ;;  %s1382_s14 = sphi %s1422_s14, %s1782_s14   ;;  %s1378_s13 = sphi %s1420_s13, %s1781_s13   ;;  %s1374_s12 = sphi %s1418_s12, %s1780_s12  }
   0x7   : > { %p40_p0 = scmp.ne.s32.totalorder %s1378_s13, %s1374_s12  ;;  %p1764_p1 = scmp.eq.s32.totalorder %s1439_s16, 0 }
   0x8   : > { %p112_p3 = scmp.eq.s32.totalorder %s1022_s17, 1  ;;  %p1023_p5 = scmp.ge.s32.totalorder %s1386_s15, 1 }
   0x9   : > { %p1448_p4 = por %p1764_p1, %p40_p0  ;;  %p119_p7 = scmp.lt.s32.totalorder %s1386_s15, 3 }
   0xa   : > { %p1453_p6 = por %p112_p3, %p40_p0  ;;  %s1388_s21 = smov [#allocation5]  }
   0xb   : > { %s1767_s18 = scalar_select %p1448_p4, 1, 0 }
   0xc   : > { %s1768_s19 = scalar_select %p1453_p6, 1, 0 }
   0xd   : > { %p1458_p8 = pnand %p1023_p5, %p119_p7  ;;  %s131_s22 = sshll.u32 %s1388_s21, 4  ;;  %s1462_s22 = int_to_ptr.vmem [resolvable:$true] %s131_s22 }
   0xe   : > { %s1474_s24 = sadd.s32 1, %s1386_s15   ;;  %s27_s25 = sadd.s32 1, %s1382_s14 }
   0xf   : > { %s1769_s20 = scalar_select %p1458_p8, 1, 0 }
  0x10   : > { %p1162_p9 = pneg %p1458_p8  ;;  %s24_s26 = ssub.s32 %s1386_s15, %s1474_s24 }
  0x11   : > { %s1258_s29 = scalar_lea.hbm %s1761_s1, 2048 }
  0x12   : > { %p1469_p11 = pnand %p1162_p9, %p1764_p1  ;;  %p1259_p12 = scmp.ne.s32.totalorder %s1761_s1, %s1258_s29 }
  0x13   : > { %p1265_p5 = scmp.lt.u32.totalorder %s1258_s29, %s1761_s1 }
  0x14   : > { %p1260_p13 = pneg %p1469_p11 }
  0x16   : > { %p1261_p0 = pnand %p1260_p13, %p1259_p12 }
  0x18   : > { %p1262_p3 = pneg %p1261_p0 }
  0x1a   : > { %p1267_p7 = pnand %p1265_p5, %p1262_p3 }
  0x1c   : > { %1270 = shalt.err (!%p1267_p7)
}
  0x1d   : > { %s1271_s7 = scalar_lea.vmem %s1462_s22, 2048  ;;  %p1279_p2 = scmp.lt.s32.totalorder %s1462_s22, %s1462_s22 }
  0x1e   : > { %p1272_p9 = scmp.ne.s32.totalorder %s1462_s22, %s1271_s7  ;;  %p1280_p6 = scmp.lt.s32.totalorder %s1271_s7, %s1271_s7 }
  0x20   : > { %p1274_p10 = pnand %p1272_p9, %p1260_p13  ;;  %p1281_p4 = por %p1280_p6, %p1279_p2 }
  0x22   : > { %p1275_p1 = pneg %p1274_p10 }
  0x24   : > { %p1282_p8 = pnand %p1281_p4, %p1275_p1 }
  0x26   : > { %1285 = shalt.err (!%p1282_p8)
}
  0x27   : > { %s1389_s8 = smov 128   ;;  %s1390_s9 = smov 8  }
  0x28   : > { %1165 = dma.hbm_to_vmem [thread:$0]  (!%p1469_p11), %s1761_s1, 2048, %s1462_s22, [#allocation6], %s1389_s8, %s1389_s8, %s1390_s9  }
  0x29   : > { %p25_p2 = scmp.eq.s32.totalorder %s24_s26, 0  ;;  %p34_p1 = scmp.ne.s32.totalorder %s1382_s14, %s1378_s13 }
  0x2a   : > { %p35_p4 = scmp.eq.s32.totalorder %s1386_s15, 0  ;;  %p1175_p6 = scmp.lt.s32.totalorder %s1386_s15, 2 }
  0x2b   : > { %s1505_s17 = scalar_select %p25_p2, %s1382_s14, %s27_s25  }
  0x2c   : > { %p36_p8 = por %p35_p4, %p34_p1  ;;  %p1771_p10 = scmp.eq.s32.totalorder %s1439_s16, 1 }
  0x2d   : > { %s148_s27 = sand.u32 1, %s1382_s14   ;;  %s1103_s28 = sshll.u32 %s1386_s15, 11 }
  0x2e   : > { %p1509_p12 = por %p1771_p10, %p34_p1  ;;  %s1026_s29 = sshll.u32 %s148_s27, 7 }
  0x2f   : > { %s1518_s4 = scalar_lea.hbm %s1760_s0, %s1103_s28  ;;  %s152_s22 = scalar_lea.vmem [#allocation2], %s1026_s29 }
  0x30   : > { %s159_s25 = sshll.u32 %s152_s22, 4  ;;  %p1520_p11 = pnand %p1175_p6, %p36_p8  ;;  %s1524_s25 = int_to_ptr.vmem [resolvable:$true] %s159_s25 }
  0x31   : > { %s1526_s5 = scalar_lea.sflag [#allocation3], %s148_s27  ;;  %s1286_s6 = scalar_lea.hbm %s1518_s4, 2048 }
  0x32   : > { %p1287_p13 = scmp.ne.s32.totalorder %s1518_s4, %s1286_s6  ;;  %p1288_p0 = pneg %p1520_p11 }
  0x33   : > { %s1291_s9 = scalar_lea.hbm %s1760_s0, 4096  ;;  %p1292_p7 = scmp.lt.u32.totalorder %s1518_s4, %s1760_s0 }
  0x34   : > { %p1289_p3 = pnand %p1288_p0, %p1287_p13  ;;  %p1293_p9 = scmp.lt.u32.totalorder %s1291_s9, %s1286_s6 }
  0x35   : > { %p1295_p1 = scmp.lt.u32.totalorder %s1286_s6, %s1518_s4 }
  0x36   : > { %p1290_p5 = pneg %p1289_p3  ;;  %p1294_p2 = por %p1293_p9, %p1292_p7 }
  0x38   : > { %p1296_p4 = por %p1295_p1, %p1294_p2 }
  0x3a   : > { %p1297_p6 = pnand %p1296_p4, %p1290_p5 }
  0x3c   : > { %1300 = shalt.err (!%p1297_p6)
}
  0x3d   : > { %s1301_s27 = scalar_lea.vmem %s1524_s25, 2048  ;;  %s1391_s28 = smov [#allocation2]  }
  0x3e   : > { %p1302_p8 = scmp.ne.s32.totalorder %s1524_s25, %s1301_s27  ;;  %s1306_s29 = sshll.u32 %s1391_s28, 4  ;;  %s1307_s29 = int_to_ptr.vmem [resolvable:$false] %s1306_s29 }
  0x3f   : > { %s1308_s23 = scalar_lea.vmem %s1307_s29, 4096  ;;  %p1309_p3 = scmp.lt.s32.totalorder %s1524_s25, %s1307_s29 }
  0x40   : > { %p1304_p10 = pnand %p1302_p8, %p1288_p0  ;;  %p1310_p7 = scmp.lt.s32.totalorder %s1308_s23, %s1301_s27 }
  0x42   : > { %p1305_p13 = pneg %p1304_p10  ;;  %p1311_p9 = por %p1310_p7, %p1309_p3 }
  0x44   : > { %p1312_p2 = pnand %p1311_p9, %p1305_p13 }
  0x46   : > { %1315 = shalt.err (!%p1312_p2)
}
  0x47   : > { %s1392_s30 = smov 64   ;;  %s1393_s22 = smov 4  }
  0x48   : > { %1169 = dma.hbm_to_vmem [thread:$0]  (!%p1520_p11), %s1518_s4, 2048, %s1524_s25, %s1526_s5, %s1392_s30, %s1392_s30, %s1393_s22  }
  0x49   : > { %p1774_p0 = scmp.ne.s32.totalorder %s1769_s20, 0 }
  0x4a   : > { %s1557_s6 = sand.u32 (!%p1774_p0), 1, %s1378_s13   ;;  %p1775_p5 = scmp.ne.s32.totalorder (!%p1774_p0), %s1767_s18, 0 }
  0x4b   : > { %171 = sbr.rel (%p1774_p0) target bundleno = 412 (0x19c), region = 32  ;;  %s1030_s7 = sshll.u32 (!%p1774_p0), %s1557_s6, 7 }
  0x4c   : > { %s174_s8 = scalar_lea.sflag (!%p1774_p0), [#allocation3], %s1557_s6  ;;  %s1561_s9 = scalar_lea.vmem (!%p1774_p0), [#allocation2], %s1030_s7 }
  0x52   : > { %1361 = dma.done.wait (%p1775_p5), %s174_s8, 2048  }
  0x53   : > { %1363 = vsyncadd (%p1775_p5), %s174_s8, 4294965248  ;;  %p1776_p11 = scmp.eq.s32.totalorder %s1439_s16, 0 }
  0x55   : > { %1365 = dma.done.wait (%p1776_p11), [#allocation6], 2048   ;;  %p1777_p1 = pmov %p1776_p11 }
  0x56   : > { %v1394_v0 = vmov 0   ;;  %v1218_v1 = vld [vmem:[#allocation5 + $0x4] ss:$8 sps:$4 sm:$0xff]   ;;  %v1220_v2 = vld [vmem:[#allocation5] ss:$8 sps:$4 sm:$0xff]   ;;  %v1246_v21 = vld [vmem:[%s1561_s9 + $0x10] sm:$0xff]   ;;  %v257_v33 = vlaneseq }
  0x57   : > { %1367 = vsyncadd (%p1777_p1), [#allocation6], 4294965248  ;;  %475 = vmatprep.mubr.bf16.mxu0 %v1394_v0  ;;  %555 = vmatprep.mubr.bf16.mxu1 %v1394_v0  ;;  %v1221_v3 = vld [vmem:[#allocation5 + $0x14] ss:$8 sps:$4 sm:$0xff]   ;;  %v1223_v4 = vld [vmem:[#allocation5 + $0x10] ss:$8 sps:$4 sm:$0xff]  }
  0x58   : > { %443 = vmatprep.subr.bf16.mxu0 %v1218_v1  ;;  %1138 = vmatprep.subr.bf16.mxu1 %v1218_v1  ;;  %v1224_v5 = vld [vmem:[#allocation5 + $0x24] ss:$8 sps:$4 sm:$0xff]   ;;  %v1226_v6 = vld [vmem:[#allocation5 + $0x20] ss:$8 sps:$4 sm:$0xff]   ;;  %v1227_v7 = vld [vmem:[#allocation5 + $0x34] ss:$8 sps:$4 sm:$0xff]  }
  0x59   : > { %444 = vmatpush1.bf16.msra.mxu0 %v1220_v2  ;;  %1146 = vmatpush1.bf16.msra.mxu1 %v1220_v2  ;;  %v1229_v8 = vld [vmem:[#allocation5 + $0x30] ss:$8 sps:$4 sm:$0xff]   ;;  %v1230_v9 = vld [vmem:[#allocation5 + $0x44] ss:$8 sps:$4 sm:$0xff]   ;;  %v1232_v10 = vld [vmem:[#allocation5 + $0x40] ss:$8 sps:$4 sm:$0xff]  }
  0x5a   : > { %445 = vmatprep.subr.bf16.mxu0 %v1221_v3  ;;  %1139 = vmatprep.subr.bf16.mxu1 %v1221_v3  ;;  %v1233_v11 = vld [vmem:[#allocation5 + $0x54] ss:$8 sps:$4 sm:$0xff]   ;;  %v1235_v12 = vld [vmem:[#allocation5 + $0x50] ss:$8 sps:$4 sm:$0xff]   ;;  %v1236_v13 = vld [vmem:[#allocation5 + $0x64] ss:$8 sps:$4 sm:$0xff]  }
  0x5b   : > { %v1238_v14 = vld [vmem:[#allocation5 + $0x60] ss:$8 sps:$4 sm:$0xff]   ;;  %v1239_v15 = vld [vmem:[#allocation5 + $0x74] ss:$8 sps:$4 sm:$0xff]   ;;  %v1241_v16 = vld [vmem:[#allocation5 + $0x70] ss:$8 sps:$4 sm:$0xff]  }
  0x5c   : > { %v1242_v17 = vld [vmem:[%s1561_s9] sm:$0xff]   ;;  %v1244_v19 = vld [vmem:[%s1561_s9 + $0x8] sm:$0xff]   ;;  %v1247_v22 = vld [vmem:[%s1561_s9 + $0x50] sm:$0xff]   ;;  %v258_v34 = vshrl.u32 %v257_v33, 7  ;;  %s1032_s4 = sshll.u32 %s1557_s6, 8  ;;  %s1137_s26 = sshll.u32 %s1439_s16, 12 }
  0x5d   : > { %446 = vmatpush1.bf16.msra.mxu0 %v1223_v4  ;;  %1147 = vmatpush1.bf16.msra.mxu1 %v1223_v4  ;;  %v1243_v18 = vld [vmem:[%s1561_s9 + $0x40] sm:$0xff]   ;;  %v1245_v20 = vld [vmem:[%s1561_s9 + $0x48] sm:$0xff]   ;;  %v1248_v23 = vld [vmem:[%s1561_s9 + $0x18] sm:$0xff]   ;;  %s1619_s25 = scalar_lea.vmem [#allocation7], %s1032_s4  ;;  %s1710_s27 = scalar_lea.hbm %s1763_s3, %s1137_s26 }
  0x5e   : > { %447 = vmatprep.subr.bf16.mxu0 %v1224_v5  ;;  %1140 = vmatprep.subr.bf16.mxu1 %v1224_v5  ;;  %v1249_v24 = vld [vmem:[%s1561_s9 + $0x58] sm:$0xff]   ;;  %v1250_v25 = vld [vmem:[%s1561_s9 + $0x20] sm:$0xff]   ;;  %v1252_v27 = vld [vmem:[%s1561_s9 + $0x28] sm:$0xff]   ;;  %v259_v35 = vsub.s32 0, %v258_v34  ;;  %v263_v37 = vsub.s32 1, %v258_v34  ;;  %s939_s5 = sshll.u32 %s1619_s25, 4  ;;  %s1712_s5 = int_to_ptr.vmem [resolvable:$true] %s939_s5 }
  0x5f   : > { %v1251_v26 = vld [vmem:[%s1561_s9 + $0x60] sm:$0xff]   ;;  %v1253_v28 = vld [vmem:[%s1561_s9 + $0x68] sm:$0xff]   ;;  %v1254_v29 = vld [vmem:[%s1561_s9 + $0x30] sm:$0xff]   ;;  %s925_s16 = scalar_lea.sflag [#allocation4], %s1557_s6  ;;  %s1316_s28 = scalar_lea.vmem %s1712_s5, 4096 }
  0x60   : > { %v1255_v30 = vld [vmem:[%s1561_s9 + $0x70] sm:$0xff]   ;;  %v1256_v31 = vld [vmem:[%s1561_s9 + $0x38] sm:$0xff]   ;;  %v255_v36 = vld [vmem:[%s1762_s2] sm:$0x3]  ;;  %p1317_p4 = scmp.ne.s32.totalorder %s1712_s5, %s1316_s28  ;;  %s1395_s29 = smov [#allocation7]  }
  0x61   : > { %448 = vmatpush1.bf16.msra.mxu0 %v1226_v6  ;;  %1148 = vmatpush1.bf16.msra.mxu1 %v1226_v6  ;;  %v1257_v32 = vld [vmem:[%s1561_s9 + $0x78] sm:$0xff]   ;;  %v1606_v38 = vrot.slane %v255_v36, %v259_v35  ;;  %v1608_v39 = vrot.slane %v255_v36, %v263_v37  ;;  %s1320_s23 = sshll.u32 %s1395_s29, 4  ;;  %s1321_s23 = int_to_ptr.vmem [resolvable:$false] %s1320_s23 }
  0x62   : > { %449 = vmatprep.subr.bf16.mxu0 %v1227_v7  ;;  %1141 = vmatprep.subr.bf16.mxu1 %v1227_v7  ;;  %p1318_p6 = pnand %p1317_p4, %p1509_p12  ;;  %s1322_s30 = scalar_lea.vmem %s1321_s23, 8192 }
  0x63   : > { %p1323_p10 = scmp.lt.s32.totalorder %s1712_s5, %s1321_s23  ;;  %p1324_p13 = scmp.lt.s32.totalorder %s1322_s30, %s1316_s28 }
  0x64   : > { %p1319_p8 = pneg %p1318_p6 }
  0x65   : > { %450 = vmatpush1.bf16.msra.mxu0 %v1229_v8  ;;  %1149 = vmatpush1.bf16.msra.mxu1 %v1229_v8  ;;  %p1325_p3 = por %p1324_p13, %p1323_p10 }
  0x66   : > { %451 = vmatprep.subr.bf16.mxu0 %v1230_v9  ;;  %1142 = vmatprep.subr.bf16.mxu1 %v1230_v9 }
  0x67   : > { %p1326_p7 = pnand %p1325_p3, %p1319_p8 }
  0x69   : > { %452 = vmatpush1.bf16.msra.mxu0 %v1232_v10  ;;  %1150 = vmatpush1.bf16.msra.mxu1 %v1232_v10 }
  0x6a   : > { %453 = vmatprep.subr.bf16.mxu0 %v1233_v11  ;;  %1143 = vmatprep.subr.bf16.mxu1 %v1233_v11 }
  0x6d   : > { %454 = vmatpush1.bf16.msra.mxu0 %v1235_v12  ;;  %1151 = vmatpush1.bf16.msra.mxu1 %v1235_v12 }
  0x6e   : > { %455 = vmatprep.subr.bf16.mxu0 %v1236_v13  ;;  %1144 = vmatprep.subr.bf16.mxu1 %v1236_v13 }
  0x71   : > { %456 = vmatpush1.bf16.msra.mxu0 %v1238_v14  ;;  %1152 = vmatpush1.bf16.msra.mxu1 %v1238_v14 }
  0x72   : > { %457 = vmatprep.subr.bf16.mxu0 %v1239_v15  ;;  %1145 = vmatprep.subr.bf16.mxu1 %v1239_v15 }
  0x75   : > { %458 = vmatpush1.bf16.msra.mxu0 %v1241_v16  ;;  %1153 = vmatpush1.bf16.msra.mxu1 %v1241_v16 }
  0x78   : > { %476 = vmatmul.mubr.bf16.vlgmr.msra.gmra.mrb[0].mxu0 %v1242_v17  ;;  %556 = vmatmul.mubr.bf16.vlgmr.msra.gmra.mrb[0].mxu1 %v1243_v18 }
  0x79   : > { %485 = vmatprep.mubr.bf16.mxu0 %v1394_v0  ;;  %565 = vmatprep.mubr.bf16.mxu1 %v1394_v0 }
  0x80   : > { %486 = vmatmul.mubr.bf16.gmra.mrb[4].mxu0 %v1244_v19  ;;  %566 = vmatmul.mubr.bf16.gmra.mrb[4].mxu1 %v1245_v20 }
  0x81   : > { %495 = vmatprep.mubr.bf16.mxu0 %v1394_v0  ;;  %575 = vmatprep.mubr.bf16.mxu1 %v1394_v0 }
  0x88   : > { %496 = vmatmul.mubr.bf16.gmra.mrb[8].mxu0 %v1246_v21  ;;  %576 = vmatmul.mubr.bf16.gmra.mrb[8].mxu1 %v1247_v22 }
  0x89   : > { %505 = vmatprep.mubr.bf16.mxu0 %v1394_v0  ;;  %585 = vmatprep.mubr.bf16.mxu1 %v1394_v0 }
  0x90   : > { %506 = vmatmul.mubr.bf16.gmra.mrb[12].mxu0 %v1248_v23  ;;  %586 = vmatmul.mubr.bf16.gmra.mrb[12].mxu1 %v1249_v24 }
  0x91   : > { %515 = vmatprep.mubr.bf16.mxu0 %v1394_v0  ;;  %595 = vmatprep.mubr.bf16.mxu1 %v1394_v0 }
  0x98   : > { %516 = vmatmul.mubr.bf16.gmra.mrb[16].mxu0 %v1250_v25  ;;  %596 = vmatmul.mubr.bf16.gmra.mrb[16].mxu1 %v1251_v26 }
  0x99   : > { %525 = vmatprep.mubr.bf16.mxu0 %v1394_v0  ;;  %605 = vmatprep.mubr.bf16.mxu1 %v1394_v0 }
  0xa0   : > { %526 = vmatmul.mubr.bf16.gmra.mrb[20].mxu0 %v1252_v27  ;;  %606 = vmatmul.mubr.bf16.gmra.mrb[20].mxu1 %v1253_v28 }
  0xa1   : > { %535 = vmatprep.mubr.bf16.mxu0 %v1394_v0  ;;  %615 = vmatprep.mubr.bf16.mxu1 %v1394_v0 }
  0xa8   : > { %536 = vmatmul.mubr.bf16.gmra.mrb[24].mxu0 %v1254_v29  ;;  %616 = vmatmul.mubr.bf16.gmra.mrb[24].mxu1 %v1255_v30 }
  0xa9   : > { %545 = vmatprep.mubr.bf16.mxu0 %v1394_v0  ;;  %625 = vmatprep.mubr.bf16.mxu1 %v1394_v0 }
  0xb0   : > { %546 = vmatmul.mubr.bf16.gmra.mrb[28].mxu0 %v1256_v31  ;;  %626 = vmatmul.mubr.bf16.gmra.mrb[28].mxu1 %v1257_v32 }
 0x14b   : > { %v477_v40 = vpop.f32.mrb[0].mxu0  ;;  %v557_v41 = vpop.f32.mrb[0].mxu1 }
 0x14c   : > { %v478_v42 = vadd.f32 %v477_v40, %v1606_v38  ;;  %v558_v43 = vadd.f32 %v557_v41, %v1606_v38  ;;  %v479_v44 = vpop.f32.mrb[1].mxu0  ;;  %v559_v45 = vpop.f32.mrb[1].mxu1 }
 0x14d   : > { %v480_v46 = vadd.f32 %v479_v44, %v1608_v39  ;;  %v560_v47 = vadd.f32 %v559_v45, %v1608_v39  ;;  %v481_v48 = vpop.f32.mrb[2].mxu0  ;;  %v561_v49 = vpop.f32.mrb[2].mxu1 }
 0x14e   : > { %v636_v50 = vmax.f32 %v478_v42, 0.0  ;;  %v668_v51 = vmax.f32 %v558_v43, 0.0  ;;  %v482_v52 = vadd.f32 %v481_v48, %v1606_v38  ;;  %v562_v53 = vadd.f32 %v561_v49, %v1606_v38  ;;  %v483_v54 = vpop.f32.mrb[3].mxu0  ;;  %v563_v55 = vpop.f32.mrb[3].mxu1 }
 0x14f   : > { %v637_v56 = vmax.f32 %v480_v46, 0.0  ;;  %v669_v57 = vmax.f32 %v560_v47, 0.0  ;;  %v484_v58 = vadd.f32 %v483_v54, %v1608_v39  ;;  %v564_v59 = vadd.f32 %v563_v55, %v1608_v39 }
 0x150   : > { %v638_v60 = vmax.f32 %v482_v52, 0.0  ;;  %v670_v61 = vmax.f32 %v562_v53, 0.0 }
 0x151   : > { %v1104_v62 = vpack.c.bf16 %v637_v56, %v636_v50  ;;  %v1120_v63 = vpack.c.bf16 %v669_v57, %v668_v51  ;;  %v639_v0 = vmax.f32 %v484_v58, 0.0  ;;  %v671_v1 = vmax.f32 %v564_v59, 0.0 }
 0x153   : > { %892 = vst [vmem:[%s1619_s25] sm:$0xff] %v1104_v62  ;;  %908 = vst [vmem:[%s1619_s25 + $0x80] sm:$0xff] %v1120_v63  ;;  %v1105_v2 = vpack.c.bf16 %v639_v0, %v638_v60  ;;  %v1121_v3 = vpack.c.bf16 %v671_v1, %v670_v61  ;;  %v487_v4 = vpop.f32.mrb[4].mxu0  ;;  %v567_v5 = vpop.f32.mrb[4].mxu1 }
 0x154   : > { %v488_v6 = vadd.f32 %v487_v4, %v1606_v38  ;;  %v568_v7 = vadd.f32 %v567_v5, %v1606_v38  ;;  %v489_v8 = vpop.f32.mrb[5].mxu0  ;;  %v569_v9 = vpop.f32.mrb[5].mxu1 }
 0x155   : > { %893 = vst [vmem:[%s1619_s25 + $0x8] sm:$0xff] %v1105_v2  ;;  %909 = vst [vmem:[%s1619_s25 + $0x88] sm:$0xff] %v1121_v3  ;;  %v490_v10 = vadd.f32 %v489_v8, %v1608_v39  ;;  %v570_v11 = vadd.f32 %v569_v9, %v1608_v39  ;;  %v491_v12 = vpop.f32.mrb[6].mxu0  ;;  %v571_v13 = vpop.f32.mrb[6].mxu1 }
 0x156   : > { %v640_v14 = vmax.f32 %v488_v6, 0.0  ;;  %v672_v15 = vmax.f32 %v568_v7, 0.0  ;;  %v492_v16 = vadd.f32 %v491_v12, %v1606_v38  ;;  %v572_v17 = vadd.f32 %v571_v13, %v1606_v38  ;;  %v493_v18 = vpop.f32.mrb[7].mxu0  ;;  %v573_v19 = vpop.f32.mrb[7].mxu1 }
 0x157   : > { %v641_v20 = vmax.f32 %v490_v10, 0.0  ;;  %v673_v21 = vmax.f32 %v570_v11, 0.0  ;;  %v494_v22 = vadd.f32 %v493_v18, %v1608_v39  ;;  %v574_v23 = vadd.f32 %v573_v19, %v1608_v39 }
 0x158   : > { %v642_v24 = vmax.f32 %v492_v16, 0.0  ;;  %v674_v25 = vmax.f32 %v572_v17, 0.0 }
 0x159   : > { %v1106_v26 = vpack.c.bf16 %v641_v20, %v640_v14  ;;  %v1122_v27 = vpack.c.bf16 %v673_v21, %v672_v15  ;;  %v643_v28 = vmax.f32 %v494_v22, 0.0  ;;  %v675_v29 = vmax.f32 %v574_v23, 0.0 }
 0x15b   : > { %894 = vst [vmem:[%s1619_s25 + $0x10] sm:$0xff] %v1106_v26  ;;  %910 = vst [vmem:[%s1619_s25 + $0x90] sm:$0xff] %v1122_v27  ;;  %v1107_v30 = vpack.c.bf16 %v643_v28, %v642_v24  ;;  %v1123_v31 = vpack.c.bf16 %v675_v29, %v674_v25  ;;  %v497_v32 = vpop.f32.mrb[8].mxu0  ;;  %v577_v33 = vpop.f32.mrb[8].mxu1 }
 0x15c   : > { %v498_v34 = vadd.f32 %v497_v32, %v1606_v38  ;;  %v578_v35 = vadd.f32 %v577_v33, %v1606_v38  ;;  %v499_v36 = vpop.f32.mrb[9].mxu0  ;;  %v579_v37 = vpop.f32.mrb[9].mxu1 }
 0x15d   : > { %895 = vst [vmem:[%s1619_s25 + $0x18] sm:$0xff] %v1107_v30  ;;  %911 = vst [vmem:[%s1619_s25 + $0x98] sm:$0xff] %v1123_v31  ;;  %v500_v40 = vadd.f32 %v499_v36, %v1608_v39  ;;  %v580_v41 = vadd.f32 %v579_v37, %v1608_v39  ;;  %v501_v42 = vpop.f32.mrb[10].mxu0  ;;  %v581_v43 = vpop.f32.mrb[10].mxu1 }
 0x15e   : > { %v644_v44 = vmax.f32 %v498_v34, 0.0  ;;  %v676_v45 = vmax.f32 %v578_v35, 0.0  ;;  %v502_v46 = vadd.f32 %v501_v42, %v1606_v38  ;;  %v582_v47 = vadd.f32 %v581_v43, %v1606_v38  ;;  %v503_v48 = vpop.f32.mrb[11].mxu0  ;;  %v583_v49 = vpop.f32.mrb[11].mxu1 }
 0x15f   : > { %v645_v50 = vmax.f32 %v500_v40, 0.0  ;;  %v677_v51 = vmax.f32 %v580_v41, 0.0  ;;  %v504_v52 = vadd.f32 %v503_v48, %v1608_v39  ;;  %v584_v53 = vadd.f32 %v583_v49, %v1608_v39 }
 0x160   : > { %v646_v54 = vmax.f32 %v502_v46, 0.0  ;;  %v678_v55 = vmax.f32 %v582_v47, 0.0 }
 0x161   : > { %v1108_v56 = vpack.c.bf16 %v645_v50, %v644_v44  ;;  %v1124_v57 = vpack.c.bf16 %v677_v51, %v676_v45  ;;  %v647_v58 = vmax.f32 %v504_v52, 0.0  ;;  %v679_v59 = vmax.f32 %v584_v53, 0.0 }
 0x163   : > { %896 = vst [vmem:[%s1619_s25 + $0x20] sm:$0xff] %v1108_v56  ;;  %912 = vst [vmem:[%s1619_s25 + $0xa0] sm:$0xff] %v1124_v57  ;;  %v1109_v60 = vpack.c.bf16 %v647_v58, %v646_v54  ;;  %v1125_v61 = vpack.c.bf16 %v679_v59, %v678_v55  ;;  %v507_v62 = vpop.f32.mrb[12].mxu0  ;;  %v587_v63 = vpop.f32.mrb[12].mxu1 }
 0x164   : > { %v508_v0 = vadd.f32 %v507_v62, %v1606_v38  ;;  %v588_v1 = vadd.f32 %v587_v63, %v1606_v38  ;;  %v509_v2 = vpop.f32.mrb[13].mxu0  ;;  %v589_v3 = vpop.f32.mrb[13].mxu1 }
 0x165   : > { %897 = vst [vmem:[%s1619_s25 + $0x28] sm:$0xff] %v1109_v60  ;;  %913 = vst [vmem:[%s1619_s25 + $0xa8] sm:$0xff] %v1125_v61  ;;  %v510_v4 = vadd.f32 %v509_v2, %v1608_v39  ;;  %v590_v5 = vadd.f32 %v589_v3, %v1608_v39  ;;  %v511_v6 = vpop.f32.mrb[14].mxu0  ;;  %v591_v7 = vpop.f32.mrb[14].mxu1 }
 0x166   : > { %v648_v8 = vmax.f32 %v508_v0, 0.0  ;;  %v680_v9 = vmax.f32 %v588_v1, 0.0  ;;  %v512_v10 = vadd.f32 %v511_v6, %v1606_v38  ;;  %v592_v11 = vadd.f32 %v591_v7, %v1606_v38  ;;  %v513_v12 = vpop.f32.mrb[15].mxu0  ;;  %v593_v13 = vpop.f32.mrb[15].mxu1 }
 0x167   : > { %v649_v14 = vmax.f32 %v510_v4, 0.0  ;;  %v681_v15 = vmax.f32 %v590_v5, 0.0  ;;  %v514_v16 = vadd.f32 %v513_v12, %v1608_v39  ;;  %v594_v17 = vadd.f32 %v593_v13, %v1608_v39 }
 0x168   : > { %v650_v18 = vmax.f32 %v512_v10, 0.0  ;;  %v682_v19 = vmax.f32 %v592_v11, 0.0 }
 0x169   : > { %v1110_v20 = vpack.c.bf16 %v649_v14, %v648_v8  ;;  %v1126_v21 = vpack.c.bf16 %v681_v15, %v680_v9  ;;  %v651_v22 = vmax.f32 %v514_v16, 0.0  ;;  %v683_v23 = vmax.f32 %v594_v17, 0.0 }
 0x16b   : > { %898 = vst [vmem:[%s1619_s25 + $0x30] sm:$0xff] %v1110_v20  ;;  %914 = vst [vmem:[%s1619_s25 + $0xb0] sm:$0xff] %v1126_v21  ;;  %v1111_v24 = vpack.c.bf16 %v651_v22, %v650_v18  ;;  %v1127_v25 = vpack.c.bf16 %v683_v23, %v682_v19  ;;  %v517_v26 = vpop.f32.mrb[16].mxu0  ;;  %v597_v27 = vpop.f32.mrb[16].mxu1 }
 0x16c   : > { %v518_v28 = vadd.f32 %v517_v26, %v1606_v38  ;;  %v598_v29 = vadd.f32 %v597_v27, %v1606_v38  ;;  %v519_v30 = vpop.f32.mrb[17].mxu0  ;;  %v599_v31 = vpop.f32.mrb[17].mxu1 }
 0x16d   : > { %899 = vst [vmem:[%s1619_s25 + $0x38] sm:$0xff] %v1111_v24  ;;  %915 = vst [vmem:[%s1619_s25 + $0xb8] sm:$0xff] %v1127_v25  ;;  %v520_v32 = vadd.f32 %v519_v30, %v1608_v39  ;;  %v600_v33 = vadd.f32 %v599_v31, %v1608_v39  ;;  %v521_v34 = vpop.f32.mrb[18].mxu0  ;;  %v601_v35 = vpop.f32.mrb[18].mxu1 }
 0x16e   : > { %v652_v36 = vmax.f32 %v518_v28, 0.0  ;;  %v684_v37 = vmax.f32 %v598_v29, 0.0  ;;  %v522_v40 = vadd.f32 %v521_v34, %v1606_v38  ;;  %v602_v41 = vadd.f32 %v601_v35, %v1606_v38  ;;  %v523_v42 = vpop.f32.mrb[19].mxu0  ;;  %v603_v43 = vpop.f32.mrb[19].mxu1 }
 0x16f   : > { %v653_v44 = vmax.f32 %v520_v32, 0.0  ;;  %v685_v45 = vmax.f32 %v600_v33, 0.0  ;;  %v524_v46 = vadd.f32 %v523_v42, %v1608_v39  ;;  %v604_v47 = vadd.f32 %v603_v43, %v1608_v39 }
 0x170   : > { %v654_v48 = vmax.f32 %v522_v40, 0.0  ;;  %v686_v49 = vmax.f32 %v602_v41, 0.0 }
 0x171   : > { %v1112_v50 = vpack.c.bf16 %v653_v44, %v652_v36  ;;  %v1128_v51 = vpack.c.bf16 %v685_v45, %v684_v37  ;;  %v655_v52 = vmax.f32 %v524_v46, 0.0  ;;  %v687_v53 = vmax.f32 %v604_v47, 0.0 }
 0x173   : > { %900 = vst [vmem:[%s1619_s25 + $0x40] sm:$0xff] %v1112_v50  ;;  %916 = vst [vmem:[%s1619_s25 + $0xc0] sm:$0xff] %v1128_v51  ;;  %v1113_v54 = vpack.c.bf16 %v655_v52, %v654_v48  ;;  %v1129_v55 = vpack.c.bf16 %v687_v53, %v686_v49  ;;  %v527_v56 = vpop.f32.mrb[20].mxu0  ;;  %v607_v57 = vpop.f32.mrb[20].mxu1 }
 0x174   : > { %v528_v58 = vadd.f32 %v527_v56, %v1606_v38  ;;  %v608_v59 = vadd.f32 %v607_v57, %v1606_v38  ;;  %v529_v60 = vpop.f32.mrb[21].mxu0  ;;  %v609_v61 = vpop.f32.mrb[21].mxu1 }
 0x175   : > { %901 = vst [vmem:[%s1619_s25 + $0x48] sm:$0xff] %v1113_v54  ;;  %917 = vst [vmem:[%s1619_s25 + $0xc8] sm:$0xff] %v1129_v55  ;;  %v530_v62 = vadd.f32 %v529_v60, %v1608_v39  ;;  %v610_v63 = vadd.f32 %v609_v61, %v1608_v39  ;;  %v531_v0 = vpop.f32.mrb[22].mxu0  ;;  %v611_v1 = vpop.f32.mrb[22].mxu1 }
 0x176   : > { %v656_v2 = vmax.f32 %v528_v58, 0.0  ;;  %v688_v3 = vmax.f32 %v608_v59, 0.0  ;;  %v532_v4 = vadd.f32 %v531_v0, %v1606_v38  ;;  %v612_v5 = vadd.f32 %v611_v1, %v1606_v38  ;;  %v533_v6 = vpop.f32.mrb[23].mxu0  ;;  %v613_v7 = vpop.f32.mrb[23].mxu1 }
 0x177   : > { %v657_v8 = vmax.f32 %v530_v62, 0.0  ;;  %v689_v9 = vmax.f32 %v610_v63, 0.0  ;;  %v534_v10 = vadd.f32 %v533_v6, %v1608_v39  ;;  %v614_v11 = vadd.f32 %v613_v7, %v1608_v39 }
 0x178   : > { %v658_v12 = vmax.f32 %v532_v4, 0.0  ;;  %v690_v13 = vmax.f32 %v612_v5, 0.0 }
 0x179   : > { %v1114_v14 = vpack.c.bf16 %v657_v8, %v656_v2  ;;  %v1130_v15 = vpack.c.bf16 %v689_v9, %v688_v3  ;;  %v659_v16 = vmax.f32 %v534_v10, 0.0  ;;  %v691_v17 = vmax.f32 %v614_v11, 0.0 }
 0x17b   : > { %902 = vst [vmem:[%s1619_s25 + $0x50] sm:$0xff] %v1114_v14  ;;  %918 = vst [vmem:[%s1619_s25 + $0xd0] sm:$0xff] %v1130_v15  ;;  %v1115_v18 = vpack.c.bf16 %v659_v16, %v658_v12  ;;  %v1131_v19 = vpack.c.bf16 %v691_v17, %v690_v13  ;;  %v537_v20 = vpop.f32.mrb[24].mxu0  ;;  %v617_v21 = vpop.f32.mrb[24].mxu1 }
 0x17c   : > { %v538_v22 = vadd.f32 %v537_v20, %v1606_v38  ;;  %v618_v23 = vadd.f32 %v617_v21, %v1606_v38  ;;  %v539_v24 = vpop.f32.mrb[25].mxu0  ;;  %v619_v25 = vpop.f32.mrb[25].mxu1 }
 0x17d   : > { %903 = vst [vmem:[%s1619_s25 + $0x58] sm:$0xff] %v1115_v18  ;;  %919 = vst [vmem:[%s1619_s25 + $0xd8] sm:$0xff] %v1131_v19  ;;  %v540_v26 = vadd.f32 %v539_v24, %v1608_v39  ;;  %v620_v27 = vadd.f32 %v619_v25, %v1608_v39  ;;  %v541_v28 = vpop.f32.mrb[26].mxu0  ;;  %v621_v29 = vpop.f32.mrb[26].mxu1 }
 0x17e   : > { %v660_v30 = vmax.f32 %v538_v22, 0.0  ;;  %v692_v31 = vmax.f32 %v618_v23, 0.0  ;;  %v542_v32 = vadd.f32 %v541_v28, %v1606_v38  ;;  %v622_v33 = vadd.f32 %v621_v29, %v1606_v38  ;;  %v543_v34 = vpop.f32.mrb[27].mxu0  ;;  %v623_v35 = vpop.f32.mrb[27].mxu1 }
 0x17f   : > { %v661_v36 = vmax.f32 %v540_v26, 0.0  ;;  %v693_v37 = vmax.f32 %v620_v27, 0.0  ;;  %v544_v40 = vadd.f32 %v543_v34, %v1608_v39  ;;  %v624_v41 = vadd.f32 %v623_v35, %v1608_v39 }
 0x180   : > { %v662_v42 = vmax.f32 %v542_v32, 0.0  ;;  %v694_v43 = vmax.f32 %v622_v33, 0.0 }
 0x181   : > { %v1116_v44 = vpack.c.bf16 %v661_v36, %v660_v30  ;;  %v1132_v45 = vpack.c.bf16 %v693_v37, %v692_v31  ;;  %v663_v46 = vmax.f32 %v544_v40, 0.0  ;;  %v695_v47 = vmax.f32 %v624_v41, 0.0 }
 0x183   : > { %904 = vst [vmem:[%s1619_s25 + $0x60] sm:$0xff] %v1116_v44  ;;  %920 = vst [vmem:[%s1619_s25 + $0xe0] sm:$0xff] %v1132_v45  ;;  %v1117_v48 = vpack.c.bf16 %v663_v46, %v662_v42  ;;  %v1133_v49 = vpack.c.bf16 %v695_v47, %v694_v43  ;;  %v547_v50 = vpop.f32.mrb[28].mxu0  ;;  %v627_v51 = vpop.f32.mrb[28].mxu1 }
 0x184   : > { %v548_v52 = vadd.f32 %v547_v50, %v1606_v38  ;;  %v628_v53 = vadd.f32 %v627_v51, %v1606_v38  ;;  %v549_v54 = vpop.f32.mrb[29].mxu0  ;;  %v629_v55 = vpop.f32.mrb[29].mxu1 }
 0x185   : > { %905 = vst [vmem:[%s1619_s25 + $0x68] sm:$0xff] %v1117_v48  ;;  %921 = vst [vmem:[%s1619_s25 + $0xe8] sm:$0xff] %v1133_v49  ;;  %v550_v56 = vadd.f32 %v549_v54, %v1608_v39  ;;  %v630_v57 = vadd.f32 %v629_v55, %v1608_v39  ;;  %v551_v58 = vpop.f32.mrb[30].mxu0  ;;  %v631_v59 = vpop.f32.mrb[30].mxu1 }
 0x186   : > { %v664_v60 = vmax.f32 %v548_v52, 0.0  ;;  %v696_v61 = vmax.f32 %v628_v53, 0.0  ;;  %v552_v62 = vadd.f32 %v551_v58, %v1606_v38  ;;  %v632_v63 = vadd.f32 %v631_v59, %v1606_v38  ;;  %v553_v0 = vpop.f32.mrb[31].mxu0  ;;  %v633_v1 = vpop.f32.mrb[31].mxu1 }
 0x187   : > { %v665_v2 = vmax.f32 %v550_v56, 0.0  ;;  %v697_v3 = vmax.f32 %v630_v57, 0.0  ;;  %v554_v4 = vadd.f32 %v553_v0, %v1608_v39  ;;  %v634_v5 = vadd.f32 %v633_v1, %v1608_v39 }
 0x188   : > { %v666_v6 = vmax.f32 %v552_v62, 0.0  ;;  %v698_v7 = vmax.f32 %v632_v63, 0.0 }
 0x189   : > { %v1118_v8 = vpack.c.bf16 %v665_v2, %v664_v60  ;;  %v1134_v38 = vpack.c.bf16 %v697_v3, %v696_v61  ;;  %v667_v9 = vmax.f32 %v554_v4, 0.0  ;;  %v699_v10 = vmax.f32 %v634_v5, 0.0 }
 0x18b   : > { %906 = vst [vmem:[%s1619_s25 + $0x70] sm:$0xff] %v1118_v8  ;;  %922 = vst [vmem:[%s1619_s25 + $0xf0] sm:$0xff] %v1134_v38  ;;  %v1119_v39 = vpack.c.bf16 %v667_v9, %v666_v6  ;;  %v1135_v11 = vpack.c.bf16 %v699_v10, %v698_v7 }
 0x18d   : > { %907 = vst [vmem:[%s1619_s25 + $0x78] sm:$0xff] %v1119_v39  ;;  %923 = vst [vmem:[%s1619_s25 + $0xf8] sm:$0xff] %v1135_v11 }
 0x18e   : > { %1329 = shalt.err (!%p1326_p7)
}
 0x18f   : > { %s1330_s22 = scalar_lea.hbm %s1710_s27, 4096  ;;  %s1334_s9 = scalar_lea.hbm %s1763_s3, 8192 }
 0x190   : > { %p1331_p9 = scmp.ne.s32.totalorder %s1710_s27, %s1330_s22  ;;  %p1335_p5 = scmp.lt.u32.totalorder %s1710_s27, %s1763_s3 }
 0x191   : > { %p1336_p11 = scmp.lt.u32.totalorder %s1334_s9, %s1330_s22  ;;  %p1338_p4 = scmp.lt.u32.totalorder %s1330_s22, %s1710_s27 }
 0x192   : > { %p1332_p2 = pnand %p1331_p9, %p1509_p12 }
 0x193   : > { %p1337_p1 = por %p1336_p11, %p1335_p5 }
 0x194   : > { %p1333_p0 = pneg %p1332_p2 }
 0x195   : > { %p1339_p6 = por %p1338_p4, %p1337_p1 }
 0x197   : > { %p1340_p8 = pnand %p1339_p6, %p1333_p0 }
 0x199   : > { %1343 = shalt.err (!%p1340_p8)
}
 0x19a   : > { %s1396_s4 = smov 128   ;;  %s1397_s25 = smov 8  }
 0x19b   : > { %1160 = dma.vmem_to_hbm [thread:$0]  (%p1509_p12), %s1712_s5, 4096, %s1710_s27, %s925_s16, %s1396_s4, %s1396_s4, %s1397_s25  }
 0x19c PF: > { %s954_s26 = sand.u32 1, %s1374_s12   ;;  %p1778_p10 = scmp.ne.s32.totalorder %s1768_s19, 0 }
 0x19d   : > { %p1779_p13 = scmp.ge.s32.totalorder %s1386_s15, 2  ;;  %s955_s10 = scalar_lea.sflag [#allocation4], %s954_s26 }
 0x19f   : > { %p1171_p3 = pnand %p1779_p13, %p1778_p10 }
 0x1a1   : > { %1369 = dma.done.wait (!%p1171_p3), %s955_s10, 4096  }
 0x1a2   : > { %1371 = vsyncadd (!%p1171_p3), %s955_s10, 4294963200  ;;  %p17_p7 = scmp.ge.s32.totalorder %s1474_s24, 4   ;;  %s1780_s12 = smov %s1378_s13 }
 0x1a3   : > { %s1781_s13 = smov %s1382_s14  ;;  %s1782_s14 = smov %s1505_s17 }
 0x1a4   : > { %s1783_s15 = smov %s1474_s24  ;;  %19 = sbr.rel (!%p17_p7) target bundleno = 6 (0x6), region = 81 }
 0x1ab   :  { %960 = vsyncpa [#allocation3], 1 }
 0x1ac   :  { %962 = vsyncpa [#allocation3 + $0x1], 1 }
 0x1ad   :  { %963 = vsyncpa [#allocation6], 1 }
 0x1ae   :  { %964 = vsyncpa [#allocation4], 1 }
 0x1af   :  { %966 = vsyncpa [#allocation4 + $0x1], 1 }

</bundles_post_ra>
